<compile_context>
chip_gen: v5e
topology: v5e:2x2
jax: 0.10.0
libtpu: 0.0.40
codegen_flags: <defaults>
</compile_context>

<pallas_src>
import jax
import jax.numpy as jnp
from jax.experimental import pallas as pl
from jax.experimental.pallas import tpu as pltpu

H_PI = 200            # pi1 hidden width (fixed by the module)
H_V = 100             # v1 hidden width (fixed by the module)
H1 = H_PI + H_V       # fused layer-1 width
H1_PAD = 384          # explicit zero-padded lane width (multiple of 128)
OUT_PAD = 128         # lane-dense combined output slab width


def _relu6(x):
    return jnp.clip(x, 0.0, 6.0)


def net_kernel(x_ref, w1_ref, b1_ref, w2_ref, b2_ref, out_ref):
    # In-kernel cast of x to the MXU input dtype: x travels HBM->VMEM in its
    # original f32 layout (no extra wrapper HBM pass); the cast is cheap VPU
    # work hidden under the DMA/MXU. Note: on the bf16 path this reduces input
    # precision slightly (covered by the test tolerances).
    x = x_ref[...].astype(w1_ref.dtype)
    # Fused layer 1 (pi1 + v1): one MXU matmul, f32 accumulation.
    h = jnp.dot(x, w1_ref[...], preferred_element_type=jnp.float32) + b1_ref[...]
    h = _relu6(h)  # elementwise stays f32 (v5e VPU has no bf16 ALUs)
    # Fused block-diagonal layer 2 -> single lane-dense 128-wide store.
    out = jnp.dot(h.astype(w2_ref.dtype), w2_ref[...],
                  preferred_element_type=jnp.float32) + b2_ref[...]
    out_ref[...] = out.astype(out_ref.dtype)


def init_params(key, s_dim, a_dim):
    """Mirrors A3C set_init(): weight ~ N(0, 0.1), bias = 0 (original layout)."""
    k1, k2, k3, k4 = jax.random.split(key, 4)
    return {
        "wpi1": 0.1 * jax.random.normal(k1, (s_dim, H_PI), jnp.float32),
        "bpi1": jnp.zeros((1, H_PI), jnp.float32),
        "wpi2": 0.1 * jax.random.normal(k2, (H_PI, a_dim), jnp.float32),
        "bpi2": jnp.zeros((1, a_dim), jnp.float32),
        "wv1": 0.1 * jax.random.normal(k3, (s_dim, H_V), jnp.float32),
        "bv1": jnp.zeros((1, H_V), jnp.float32),
        "wv2": 0.1 * jax.random.normal(k4, (H_V, 1), jnp.float32),
        "bv2": jnp.zeros((1, 1), jnp.float32),
    }


def pack_params(p, *, compute_dtype=jnp.bfloat16):
    """Fuse + explicitly zero-pad params into the kernel layout.

    w1: [s_dim, 384]  (cols 0:200 = pi1, 200:300 = v1, rest zero)
    w2: [384, 128]    block-diagonal (rows 0:200 x cols 0:a_dim = pi2,
                      rows 200:300 x col a_dim = v2, rest zero)
    Biases stay f32. Padded lanes / padded batch rows stay exactly zero through
    relu6 and the zero-padded W2/b2, so the wrapper slices are exact.
    """
    s_dim = p["wpi1"].shape[0]
    a_dim = p["wpi2"].shape[1]
    assert a_dim + 1 <= OUT_PAD, "a_dim too large for the 128-lane output slab"

    w1 = jnp.zeros((s_dim, H1_PAD), jnp.float32)
    w1 = w1.at[:, :H_PI].set(p["wpi1"]).at[:, H_PI:H1].set(p["wv1"])
    b1 = jnp.zeros((1, H1_PAD), jnp.float32)
    b1 = b1.at[:, :H_PI].set(p["bpi1"]).at[:, H_PI:H1].set(p["bv1"])

    w2 = jnp.zeros((H1_PAD, OUT_PAD), jnp.float32)
    w2 = w2.at[:H_PI, :a_dim].set(p["wpi2"])
    w2 = w2.at[H_PI:H1, a_dim:a_dim + 1].set(p["wv2"])
    b2 = jnp.zeros((1, OUT_PAD), jnp.float32)
    b2 = b2.at[:, :a_dim].set(p["bpi2"]).at[:, a_dim:a_dim + 1].set(p["bv2"])

    return {
        "w1": w1.astype(compute_dtype),
        "b1": b1,
        "w2": w2.astype(compute_dtype),
        "b2": b2,
        "a_dim": a_dim,
        "compute_dtype": compute_dtype,
    }


def _pick_block_b(B):
    """Roofline-sized batch tile; >=2 grid steps once B is large (v7x 2-TC)."""
    if B <= 512:
        return B                       # single step, no padding pass over x
    blk = min(1024, pl.cdiv(B, 2))     # big tiles, but keep the grid >= 2
    return max(8, (blk // 8) * 8)      # sublane alignment


def net_forward(x, packed, *, block_b=None, out_dtype=None,
                vmem_limit_bytes=32 * 1024 * 1024):
    """Pallas forward. x: [B, s_dim] f32 -> (logits [B, a_dim], values [B, 1]) f32."""
    B, s_dim = x.shape
    a_dim = packed["a_dim"]
    if out_dtype is None:
        # bf16 output slab halves the dominant writeback stream; the tiny
        # logits/values slices are upcast to f32 below.
        out_dtype = packed["compute_dtype"]

    if block_b is None:
        block_b = _pick_block_b(B)
    if block_b != B and block_b % 8 != 0:
        block_b = max(8, (block_b // 8) * 8)

    B_pad = pl.cdiv(B, block_b) * block_b
    grid = (B_pad // block_b,)

    xp = x
    if B_pad != B:
        # Only materialized when block_b does not divide B (never with the
        # default tile selection above). Padded rows stay zero end-to-end.
        xp = jnp.pad(x, ((0, B_pad - B), (0, 0)))

    rep = lambda i: (0, 0)  # weights/biases replicated across the batch grid axis

    flops = 2 * B_pad * (s_dim * H1_PAD + H1_PAD * OUT_PAD)
    bytes_accessed = (
        xp.size * xp.dtype.itemsize
        + B_pad * OUT_PAD * jnp.dtype(out_dtype).itemsize
        + packed["w1"].size * packed["w1"].dtype.itemsize
        + packed["w2"].size * packed["w2"].dtype.itemsize
        + packed["b1"].size * 4 + packed["b2"].size * 4
    )
    cost = pl.CostEstimate(flops=flops, transcendentals=0,
                           bytes_accessed=bytes_accessed)

    out = pl.pallas_call(
        net_kernel,
        out_shape=jax.ShapeDtypeStruct((B_pad, OUT_PAD), out_dtype),
        grid_spec=pltpu.PrefetchScalarGridSpec(
            num_scalar_prefetch=0,
            grid=grid,
            in_specs=[
                pl.BlockSpec((block_b, s_dim), lambda i: (i, 0)),   # x (f32 in HBM)
                pl.BlockSpec((s_dim, H1_PAD), rep),                 # fused W1
                pl.BlockSpec((1, H1_PAD), rep),                     # fused b1 (f32)
                pl.BlockSpec((H1_PAD, OUT_PAD), rep),               # block-diag W2
                pl.BlockSpec((1, OUT_PAD), rep),                    # fused b2 (f32)
            ],
            out_specs=pl.BlockSpec((block_b, OUT_PAD), lambda i: (i, 0)),
        ),
        compiler_params=pltpu.CompilerParams(
            dimension_semantics=("parallel",),
            vmem_limit_bytes=vmem_limit_bytes,
        ),
        cost_estimate=cost,
    )(xp, packed["w1"], packed["b1"], packed["w2"], packed["b2"])

    logits = out[:B, :a_dim].astype(jnp.float32)
    values = out[:B, a_dim:a_dim + 1].astype(jnp.float32)
    return logits, values


def net_forward_ref(x, p):
    """Pure-JAX reference in the original per-head layout."""
    pi1 = _relu6(x @ p["wpi1"] + p["bpi1"])
    logits = pi1 @ p["wpi2"] + p["bpi2"]
    v1 = _relu6(x @ p["wv1"] + p["bv1"])
    values = v1 @ p["wv2"] + p["bv2"]
    return logits, values


if __name__ == "__main__":
    B, s_dim, a_dim = 8, 32, 8
    key = jax.random.PRNGKey(0)
    kx, kp = jax.random.split(key)
    x = jax.random.normal(kx, (B, s_dim), jnp.float32)
    params = init_params(kp, s_dim, a_dim)
    ref_logits, ref_values = net_forward_ref(x, params)

    # f32 compute + f32 output path: numerically matches the reference.
    packed_f32 = pack_params(params, compute_dtype=jnp.float32)
    logits, values = net_forward(x, packed_f32)
    jax.block_until_ready((logits, values))
    assert logits.shape == (B, a_dim) and values.shape == (B, 1)
    assert jnp.allclose(logits, ref_logits, atol=1e-4, rtol=1e-4)
    assert jnp.allclose(values, ref_values, atol=1e-4, rtol=1e-4)

    # bf16 MXU-input + bf16 writeback path (perf default): f32 accumulation,
    # loose tolerances.
    packed_bf16 = pack_params(params, compute_dtype=jnp.bfloat16)
    logits_bf, values_bf = net_forward(x, packed_bf16)
    jax.block_until_ready((logits_bf, values_bf))
    assert logits_bf.dtype == jnp.float32 and values_bf.dtype == jnp.float32
    assert jnp.allclose(logits_bf, ref_logits, atol=1.5e-1, rtol=5e-2)
    assert jnp.allclose(values_bf, ref_values, atol=1.5e-1, rtol=5e-2)

    # Medium batch (B=200 <= 512): single full-batch tile, no padding pass.
    B2 = 200
    x2 = jax.random.normal(jax.random.PRNGKey(1), (B2, s_dim), jnp.float32)
    ref_l2, ref_v2 = net_forward_ref(x2, params)
    l2, v2 = net_forward(x2, packed_f32)
    jax.block_until_ready((l2, v2))
    assert l2.shape == (B2, a_dim) and v2.shape == (B2, 1)
    assert jnp.allclose(l2, ref_l2, atol=1e-4, rtol=1e-4)
    assert jnp.allclose(v2, ref_v2, atol=1e-4, rtol=1e-4)

    # Explicit non-dividing tile: exercises the (rare) batch padding path.
    l2b, v2b = net_forward(x2, packed_f32, block_b=128)
    jax.block_until_ready((l2b, v2b))
    assert jnp.allclose(l2b, ref_l2, atol=1e-4, rtol=1e-4)
    assert jnp.allclose(v2b, ref_v2, atol=1e-4, rtol=1e-4)

    # Large batch (B=2000): block_b=1000, grid=(2,) -> parallel axis can shard
    # across v7x's two TensorCores; no padding needed.
    B3 = 2000
    x3 = jax.random.normal(jax.random.PRNGKey(2), (B3, s_dim), jnp.float32)
    ref_l3, ref_v3 = net_forward_ref(x3, params)
    l3, v3 = net_forward(x3, packed_bf16)
    jax.block_until_ready((l3, v3))
    assert l3.shape == (B3, a_dim) and v3.shape == (B3, 1)
    assert jnp.allclose(l3, ref_l3, atol=1.5e-1, rtol=5e-2)
    assert jnp.allclose(v3, ref_v3, atol=1.5e-1, rtol=5e-2)

    print("KERNEL_OK")
</pallas_src>

<mosaic_0001>
module attributes {stable_mosaic.version = 11 : i64} {
  func.func @net_kernel(%arg0: i32, %arg1: memref<8x32xf32, #tpu.memory_space<vmem>>, %arg2: memref<32x384xf32, #tpu.memory_space<vmem>>, %arg3: memref<1x384xf32, #tpu.memory_space<vmem>>, %arg4: memref<384x128xf32, #tpu.memory_space<vmem>>, %arg5: memref<1x128xf32, #tpu.memory_space<vmem>>, %arg6: memref<8x128xf32, #tpu.memory_space<vmem>>) attributes {dimension_semantics = [#tpu.dimension_semantics<parallel>], iteration_bounds = array<i64: 1>, scalar_prefetch = 0 : i64, scratch_operands = 0 : i64, tpu.core_type = #tpu.core_type<tc>, window_params = [{transform_indices = @transform_0, window_bounds = array<i64: 8, 32>}, {pipeline_mode = #tpu.pipeline_mode<synchronous>, transform_indices = @transform_1, window_bounds = array<i64: 32, 384>}, {pipeline_mode = #tpu.pipeline_mode<synchronous>, transform_indices = @transform_2, window_bounds = array<i64: 1, 384>}, {pipeline_mode = #tpu.pipeline_mode<synchronous>, transform_indices = @transform_3, window_bounds = array<i64: 384, 128>}, {pipeline_mode = #tpu.pipeline_mode<synchronous>, transform_indices = @transform_4, window_bounds = array<i64: 1, 128>}, {transform_indices = @transform_5, window_bounds = array<i64: 8, 128>}]} {
    %c0 = arith.constant 0 : index
    %c0_0 = arith.constant 0 : index
    %0 = vector.load %arg1[%c0, %c0_0] : memref<8x32xf32, #tpu.memory_space<vmem>>, vector<8x32xf32>
    %c0_1 = arith.constant 0 : index
    %c0_2 = arith.constant 0 : index
    %1 = vector.load %arg2[%c0_1, %c0_2] : memref<32x384xf32, #tpu.memory_space<vmem>>, vector<32x384xf32>
    %cst = arith.constant dense<0.000000e+00> : vector<8x384xf32>
    %2 = tpu.matmul %0, %1, %cst {dimension_numbers = #tpu.dot_dimension_numbers<[1], [0], [0], [1], [0, 0, 1, 1], [], []>} : vector<8x32xf32>, vector<32x384xf32>, vector<8x384xf32> -> vector<8x384xf32>
    %c0_3 = arith.constant 0 : index
    %c0_4 = arith.constant 0 : index
    %3 = vector.load %arg3[%c0_3, %c0_4] : memref<1x384xf32, #tpu.memory_space<vmem>>, vector<1x384xf32>
    %4 = vector.broadcast %3 : vector<1x384xf32> to vector<8x384xf32>
    %5 = arith.addf %2, %4 : vector<8x384xf32>
    %cst_5 = arith.constant 0.000000e+00 : f32
    %cst_6 = arith.constant 6.000000e+00 : f32
    %6 = vector.broadcast %cst_5 : f32 to vector<8x384xf32>
    %7 = arith.maximumf %6, %5 : vector<8x384xf32>
    %8 = vector.broadcast %cst_6 : f32 to vector<8x384xf32>
    %9 = arith.minimumf %8, %7 : vector<8x384xf32>
    %c0_7 = arith.constant 0 : index
    %c0_8 = arith.constant 0 : index
    %10 = vector.load %arg4[%c0_7, %c0_8] : memref<384x128xf32, #tpu.memory_space<vmem>>, vector<384x128xf32>
    %cst_9 = arith.constant dense<0.000000e+00> : vector<8x128xf32>
    %11 = tpu.matmul %9, %10, %cst_9 {dimension_numbers = #tpu.dot_dimension_numbers<[1], [0], [0], [1], [0, 0, 1, 1], [], []>} : vector<8x384xf32>, vector<384x128xf32>, vector<8x128xf32> -> vector<8x128xf32>
    %c0_10 = arith.constant 0 : index
    %c0_11 = arith.constant 0 : index
    %12 = vector.load %arg5[%c0_10, %c0_11] : memref<1x128xf32, #tpu.memory_space<vmem>>, vector<1x128xf32>
    %13 = vector.broadcast %12 : vector<1x128xf32> to vector<8x128xf32>
    %14 = arith.addf %11, %13 : vector<8x128xf32>
    %c0_12 = arith.constant 0 : index
    %c0_13 = arith.constant 0 : index
    %15 = vector.load %arg6[%c0_12, %c0_13] : memref<8x128xf32, #tpu.memory_space<vmem>>, vector<8x128xf32>
    tpu.vector_store %arg6[%c0_12, %c0_13], %14 {strides = array<i32>} : memref<8x128xf32, #tpu.memory_space<vmem>>, vector<8x128xf32>,
    return
  }
  func.func @transform_0(%arg0: i32) -> (i32, i32) {
    %c0_i32 = arith.constant 0 : i32
    %c0_i32_0 = arith.constant 0 : i32
    return %arg0, %c0_i32 : i32, i32
  }
  func.func @transform_1(%arg0: i32) -> (i32, i32) {
    %c0_i32 = arith.constant 0 : i32
    %c0_i32_0 = arith.constant 0 : i32
    %c0_i32_1 = arith.constant 0 : i32
    return %c0_i32, %c0_i32_0 : i32, i32
  }
  func.func @transform_2(%arg0: i32) -> (i32, i32) {
    %c0_i32 = arith.constant 0 : i32
    %c0_i32_0 = arith.constant 0 : i32
    %c0_i32_1 = arith.constant 0 : i32
    return %c0_i32, %c0_i32_0 : i32, i32
  }
  func.func @transform_3(%arg0: i32) -> (i32, i32) {
    %c0_i32 = arith.constant 0 : i32
    %c0_i32_0 = arith.constant 0 : i32
    %c0_i32_1 = arith.constant 0 : i32
    return %c0_i32, %c0_i32_0 : i32, i32
  }
  func.func @transform_4(%arg0: i32) -> (i32, i32) {
    %c0_i32 = arith.constant 0 : i32
    %c0_i32_0 = arith.constant 0 : i32
    %c0_i32_1 = arith.constant 0 : i32
    return %c0_i32, %c0_i32_0 : i32, i32
  }
  func.func @transform_5(%arg0: i32) -> (i32, i32) {
    %c0_i32 = arith.constant 0 : i32
    %c0_i32_0 = arith.constant 0 : i32
    return %arg0, %c0_i32 : i32, i32
  }
}

</mosaic_0001>

<bundles_post_ra>
// kernel: tpu_custom_call.1
= control target key start
LH: loop header
LB: loop body
LE: loop exit
PB: predicated region body
PF: predicated region fallthrough
CT: control target
= control target key end

     0   :  { %10 = vsyncpa [#allocation3], 0  ;;  %s509_s0 = inlined_call_operand.hbm [shape: f32[8,32], index: 0, kind: input, shape index: {}]   ;;  %s510_s1 = inlined_call_operand.hbm [shape: f32[32,384], index: 1, kind: input, shape index: {}]   ;;  %s511_s2 = inlined_call_operand.hbm [shape: f32[1,384], index: 2, kind: input, shape index: {}]   ;;  %s512_s3 = inlined_call_operand.hbm [shape: f32[384,128], index: 3, kind: input, shape index: {}]   ;;  %s513_s4 = inlined_call_operand.vmem [shape: f32[1,128], index: 4, kind: input, shape index: {}]   ;;  %s514_s5 = inlined_call_operand.hbm [shape: f32[8,128], index: 5, kind: output, shape index: {}]  }
   0x1   :  { %11 = vsyncpa [#allocation6], 0 }
   0x2   :  { %12 = vsyncpa [#allocation9], 0  ;;  %s29_s20 = sshll.u32 %s510_s1, 4  ;;  %s30_s20 = int_to_ptr.hbm [resolvable:$true] %s29_s20 }
   0x3   :  { %13 = vsyncpa [#allocation4], 0  ;;  %s444_s21 = smov [#allocation5]   ;;  %s19_s25 = sshll.u32 %s509_s0, 4  ;;  %s20_s25 = int_to_ptr.hbm [resolvable:$true] %s19_s25 }
   0x4   :  { %s31_s22 = sshll.u32 %s444_s21, 4  ;;  %s445_s26 = smov 384   ;;  %s32_s22 = int_to_ptr.vmem [resolvable:$true] %s31_s22 }
   0x5   :  { %s446_s27 = smov 24   ;;  %s447_s28 = smov [#allocation2]  }
   0x6   :  { %37 = dma.hbm_to_vmem [thread:$0]  %s30_s20, 1536, %s32_s22, [#allocation6], %s445_s26, %s445_s26, %s446_s27  }
   0x7   :  { %s21_s29 = sshll.u32 %s447_s28, 4  ;;  %s43_s7 = sshll.u32 %s511_s2, 4  ;;  %s22_s29 = int_to_ptr.vmem [resolvable:$true] %s21_s29  ;;  %s44_s7 = int_to_ptr.hbm [resolvable:$true] %s43_s7 }
   0x8   :  { %24 = dma.hbm_to_vmem [thread:$0]  %s20_s25, 128, %s22_s29, [#allocation3]  }
   0x9   :  { %s53_s9 = sshll.u32 %s512_s3, 4  ;;  %s448_s10 = smov [#allocation7]   ;;  %s54_s9 = int_to_ptr.hbm [resolvable:$true] %s53_s9 }
   0xa   :  { %s45_s11 = sshll.u32 %s448_s10, 4  ;;  %s449_s0 = smov [#allocation8]   ;;  %s46_s11 = int_to_ptr.vmem [resolvable:$true] %s45_s11 }
   0xb   :  { %48 = dma.hbm_to_vmem [thread:$0]  %s44_s7, 48, %s46_s11, [#allocation6]  }
   0xc   :  { %s55_s12 = sshll.u32 %s449_s0, 4  ;;  %s450_s13 = smov 128   ;;  %s56_s12 = int_to_ptr.vmem [resolvable:$true] %s55_s12 }
   0xd   :  { %s451_s14 = smov 8  }
   0xe   :  { %61 = dma.hbm_to_vmem [thread:$0]  %s54_s9, 6144, %s56_s12, [#allocation9], %s450_s13, %s450_s13, %s451_s14  }
   0xf   :  { %436 = dma.done.wait [#allocation3], 128  }
  0x10   :  { %437 = vsyncadd [#allocation3], 4294967168 }
  0x11   :  { %438 = dma.done.wait [#allocation6], 1584  }
  0x12   :  { %439 = vsyncadd [#allocation6], 4294965712 }
  0x13   :  { %440 = dma.done.wait [#allocation9], 6144  }
  0x14   :  { %441 = vsyncadd [#allocation9], 4294961152  ;;  %v90_v0 = vld [vmem:[#allocation5 + $0x48] sm:$0xff]  ;;  %v87_v1 = vld [vmem:[#allocation5 + $0x30] sm:$0xff]  ;;  %vm101_vm0 = vcmask 261120   ;;  %s452_s15 = smov [#allocation10]  }
  0x15   :  { %117 = vmatpush.msra.mxu2 %v90_v0  ;;  %v84_v2 = vld [vmem:[#allocation5 + $0x18] sm:$0xff]  ;;  %v81_v3 = vld [vmem:[#allocation5] sm:$0xff]  ;;  %v91_v7 = vld [vmem:[#allocation5 + $0x50] sm:$0xff]  ;;  %s289_s16 = sshll.u32 %s452_s15, 4  ;;  %s291_s19 = sshll.u32 %s514_s5, 4  ;;  %s290_s16 = int_to_ptr.vmem [resolvable:$true] %s289_s16  ;;  %s292_s19 = int_to_ptr.hbm [resolvable:$true] %s291_s19 }
  0x16   :  { %v186_v4 = vld [vmem:[#allocation8 + $0x78] sm:$0xff]  ;;  %v185_v5 = vld [vmem:[#allocation8 + $0x70] sm:$0xff]  ;;  %v184_v8 = vld [vmem:[#allocation8 + $0x68] sm:$0xff] }
  0x17   :  { %118 = vmatpush.msra.mxu2 %v87_v1  ;;  %v495_v6 = vld [vmem:[#allocation2] sm:$0xff]  ;;  %223 = vmatpush.msra.mxu3 %v186_v4  ;;  %v183_v12 = vld [vmem:[#allocation8 + $0x60] sm:$0xff]  ;;  %v200_v13 = vld [vmem:[#allocation8 + $0xe8] sm:$0xff] }
  0x18   :  { %v202_v9 = vld [vmem:[#allocation8 + $0xf8] sm:$0xff]  ;;  %v201_v10 = vld [vmem:[#allocation8 + $0xf0] sm:$0xff]  ;;  %v199_v18 = vld [vmem:[#allocation8 + $0xe0] sm:$0xff] }
  0x19   :  { %119 = vmatpush.msra.mxu2 %v84_v2  ;;  %224 = vmatpush.msra.mxu3 %v185_v5  ;;  %v88_v11 = vld [vmem:[#allocation5 + $0x38] sm:$0xff]  ;;  %v85_v15 = vld [vmem:[#allocation5 + $0x20] sm:$0xff]  ;;  %v216_v19 = vld [vmem:[#allocation8 + $0x168] sm:$0xff] }
  0x1a   :  { %243 = vmatpush.msra.mxu0 %v202_v9  ;;  %v218_v14 = vld [vmem:[#allocation8 + $0x178] sm:$0xff]  ;;  %v217_v17 = vld [vmem:[#allocation8 + $0x170] sm:$0xff]  ;;  %v82_v20 = vld [vmem:[#allocation5 + $0x8] sm:$0xff] }
  0x1b   :  { %120 = vmatpush.msra.mxu2 %v81_v3  ;;  %225 = vmatpush.msra.mxu3 %v184_v8  ;;  %v182_v16 = vld [vmem:[#allocation8 + $0x58] sm:$0xff]  ;;  %v181_v21 = vld [vmem:[#allocation8 + $0x50] sm:$0xff]  ;;  %v180_v24 = vld [vmem:[#allocation8 + $0x48] sm:$0xff] }
  0x1c   :  { %303 = vmatmul.msk.f32.vlgmr.msra.gmra.mxu2 %vm101_vm0, %v495_v6  ;;  %244 = vmatpush.msra.mxu0 %v201_v10  ;;  %v198_v22 = vld [vmem:[#allocation8 + $0xd8] sm:$0xff]  ;;  %v197_v25 = vld [vmem:[#allocation8 + $0xd0] sm:$0xff]  ;;  %v215_v26 = vld [vmem:[#allocation8 + $0x160] sm:$0xff] }
  0x1d   :  { %137 = vmatpush.msrb.mxu2 %v91_v7  ;;  %263 = vmatpush.msra.mxu1 %v218_v14  ;;  %v92_v23 = vld [vmem:[#allocation5 + $0x58] sm:$0xff]  ;;  %v89_v27 = vld [vmem:[#allocation5 + $0x40] sm:$0xff]  ;;  %v196_v29 = vld [vmem:[#allocation8 + $0xc8] sm:$0xff] }
  0x1e   :  { %226 = vmatpush.msra.mxu3 %v183_v12  ;;  %245 = vmatpush.msra.mxu0 %v200_v13  ;;  %v179_v28 = vld [vmem:[#allocation8 + $0x40] sm:$0xff]  ;;  %v178_v31 = vld [vmem:[#allocation8 + $0x38] sm:$0xff]  ;;  %v83_v33 = vld [vmem:[#allocation5 + $0x10] sm:$0xff] }
  0x1f   :  { %138 = vmatpush.msrb.mxu2 %v88_v11  ;;  %264 = vmatpush.msra.mxu1 %v217_v17  ;;  %v86_v30 = vld [vmem:[#allocation5 + $0x28] sm:$0xff]  ;;  %v177_v34 = vld [vmem:[#allocation8 + $0x30] sm:$0xff]  ;;  %v174_v37 = vld [vmem:[#allocation8 + $0x18] sm:$0xff] }
  0x20   :  { %227 = vmatpush.msra.mxu3 %v182_v16  ;;  %246 = vmatpush.msra.mxu0 %v199_v18  ;;  %v195_v32 = vld [vmem:[#allocation8 + $0xc0] sm:$0xff]  ;;  %v176_v35 = vld [vmem:[#allocation8 + $0x28] sm:$0xff]  ;;  %v194_v38 = vld [vmem:[#allocation8 + $0xb8] sm:$0xff] }
  0x21   :  { %139 = vmatpush.msrb.mxu2 %v85_v15  ;;  %265 = vmatpush.msra.mxu1 %v216_v19  ;;  %v175_v36 = vld [vmem:[#allocation8 + $0x20] sm:$0xff]  ;;  %v214_v39 = vld [vmem:[#allocation8 + $0x158] sm:$0xff]  ;;  %v173_v40 = vld [vmem:[#allocation8 + $0x10] sm:$0xff] }
  0x22   :  { %228 = vmatpush.msra.mxu3 %v181_v21  ;;  %247 = vmatpush.msra.mxu0 %v198_v22  ;;  %v193_v41 = vld [vmem:[#allocation8 + $0xb0] sm:$0xff]  ;;  %v172_v43 = vld [vmem:[#allocation8 + $0x8] sm:$0xff]  ;;  %v171_v46 = vld [vmem:[#allocation8] sm:$0xff] }
  0x23   :  { %140 = vmatpush.msrb.mxu2 %v82_v20  ;;  %266 = vmatpush.msra.mxu1 %v215_v26  ;;  %v213_v42 = vld [vmem:[#allocation8 + $0x150] sm:$0xff]  ;;  %v192_v44 = vld [vmem:[#allocation8 + $0xa8] sm:$0xff]  ;;  %v191_v47 = vld [vmem:[#allocation8 + $0xa0] sm:$0xff] }
  0x24   :  { %304 = vmatmul.msk.f32.vlgmr.msrb.gmra.mxu2 %vm101_vm0, %v495_v6  ;;  %229 = vmatpush.msra.mxu3 %v180_v24  ;;  %v212_v45 = vld [vmem:[#allocation8 + $0x148] sm:$0xff]  ;;  %v211_v48 = vld [vmem:[#allocation8 + $0x140] sm:$0xff]  ;;  %v190_v49 = vld [vmem:[#allocation8 + $0x98] sm:$0xff] }
  0x25   :  { %157 = vmatpush.msra.mxu2 %v92_v23  ;;  %248 = vmatpush.msra.mxu0 %v197_v25  ;;  %v210_v50 = vld [vmem:[#allocation8 + $0x138] sm:$0xff]  ;;  %v189_v51 = vld [vmem:[#allocation8 + $0x90] sm:$0xff]  ;;  %v188_v53 = vld [vmem:[#allocation8 + $0x88] sm:$0xff] }
  0x26   :  { %230 = vmatpush.msra.mxu3 %v179_v28  ;;  %267 = vmatpush.msra.mxu1 %v214_v39  ;;  %v209_v52 = vld [vmem:[#allocation8 + $0x130] sm:$0xff]  ;;  %v208_v54 = vld [vmem:[#allocation8 + $0x128] sm:$0xff]  ;;  %v187_v55 = vld [vmem:[#allocation8 + $0x80] sm:$0xff] }
  0x27   :  { %158 = vmatpush.msra.mxu2 %v89_v27  ;;  %249 = vmatpush.msra.mxu0 %v196_v29  ;;  %v207_v56 = vld [vmem:[#allocation8 + $0x120] sm:$0xff]  ;;  %v206_v57 = vld [vmem:[#allocation8 + $0x118] sm:$0xff]  ;;  %v205_v58 = vld [vmem:[#allocation8 + $0x110] sm:$0xff] }
  0x28   :  { %231 = vmatpush.msra.mxu3 %v178_v31  ;;  %268 = vmatpush.msra.mxu1 %v213_v42  ;;  %v204_v59 = vld [vmem:[#allocation8 + $0x108] sm:$0xff]  ;;  %v203_v60 = vld [vmem:[#allocation8 + $0x100] sm:$0xff]  ;;  %v93_v61 = vld [vmem:[#allocation7] sm:$0x7] }
  0x29   :  { %159 = vmatpush.msra.mxu2 %v86_v30  ;;  %250 = vmatpush.msra.mxu0 %v195_v32  ;;  %v95_v62 = vperm.slane %v93_v61, 0  ;;  %v96_v3 = vperm.slane %v93_v61, 1  ;;  %v97_v8 = vperm.slane %v93_v61, 2  ;;  %v315_v13 = vld [vmem:[%s513_s4] ss:$0 sm:$0xff] }
  0x2a   :  { %232 = vmatpush.msra.mxu3 %v177_v34  ;;  %269 = vmatpush.msra.mxu1 %v212_v45 }
  0x2b   :  { %160 = vmatpush.msra.mxu2 %v83_v33  ;;  %251 = vmatpush.msra.mxu0 %v194_v38 }
  0x2c   :  { %305 = vmatmul.msk.f32.vlgmr.msra.gmra.mxu2 %vm101_vm0, %v495_v6  ;;  %233 = vmatpush.msra.mxu3 %v176_v35 }
  0x2d   :  { %252 = vmatpush.msra.mxu0 %v193_v41  ;;  %270 = vmatpush.msra.mxu1 %v211_v48 }
  0x2e   :  { %234 = vmatpush.msra.mxu3 %v175_v36 }
  0x2f   :  { %253 = vmatpush.msra.mxu0 %v192_v44  ;;  %271 = vmatpush.msra.mxu1 %v210_v50 }
  0x30   :  { %235 = vmatpush.msra.mxu3 %v174_v37 }
  0x31   :  { %254 = vmatpush.msra.mxu0 %v191_v47  ;;  %272 = vmatpush.msra.mxu1 %v209_v52 }
  0x32   :  { %236 = vmatpush.msra.mxu3 %v173_v40 }
  0x33   :  { %255 = vmatpush.msra.mxu0 %v190_v49  ;;  %273 = vmatpush.msra.mxu1 %v208_v54 }
  0x34   :  { %237 = vmatpush.msra.mxu3 %v172_v43 }
  0x35   :  { %256 = vmatpush.msra.mxu0 %v189_v51  ;;  %274 = vmatpush.msra.mxu1 %v207_v56 }
  0x36   :  { %238 = vmatpush.msra.mxu3 %v171_v46 }
  0x37   :  { %257 = vmatpush.msra.mxu0 %v188_v53  ;;  %275 = vmatpush.msra.mxu1 %v206_v57 }
  0x39   :  { %258 = vmatpush.msra.mxu0 %v187_v55  ;;  %276 = vmatpush.msra.mxu1 %v205_v58 }
  0x3b   :  { %277 = vmatpush.msra.mxu1 %v204_v59 }
  0x3d   :  { %278 = vmatpush.msra.mxu1 %v203_v60 }
  0x9f   :  { %v122_v63 = vpop.f32.mrf.mxu2 }
  0xa0   :  { %v123_v0 = vadd.f32 %v122_v63, %v95_v62 }
  0xa2   :  { %v165_v1 = vmax.f32 %v123_v0, 0.0 }
  0xa4   :  { %v168_v2 = vmin.f32 %v165_v1, 6.0 }
  0xa6   :  { %239 = vmatmul.f32.vlgmr.msra.gmra.mxu3 %v168_v2 }
  0xa7   :  { %v142_v4 = vpop.f32.mrf.mxu2 }
  0xa8   :  { %v143_v5 = vadd.f32 %v142_v4, %v96_v3 }
  0xaa   :  { %v166_v6 = vmax.f32 %v143_v5, 0.0 }
  0xac   :  { %v169_v7 = vmin.f32 %v166_v6, 6.0 }
  0xae   :  { %259 = vmatmul.f32.vlgmr.msra.gmra.mxu0 %v169_v7 }
  0xaf   :  { %v162_v9 = vpop.f32.mrf.mxu2 }
  0xb0   :  { %v163_v10 = vadd.f32 %v162_v9, %v97_v8 }
  0xb2   :  { %v167_v11 = vmax.f32 %v163_v10, 0.0 }
  0xb4   :  { %v170_v12 = vmin.f32 %v167_v11, 6.0 }
  0xb6   :  { %279 = vmatmul.f32.vlgmr.msra.gmra.mxu1 %v170_v12 }
 0x129   :  { %v240_v14 = vpop.f32.mrf.mxu3 }
 0x12a   :  { %v241_v15 = vadd.f32 %v315_v13, %v240_v14 }
 0x12b   :  { %v260_v16 = vpop.f32.mrf.mxu0 }
 0x12c   :  { %v261_v17 = vadd.f32 %v260_v16, %v241_v15 }
 0x133   :  { %v280_v18 = vpop.f32.mrf.mxu1 }
 0x134   :  { %v281_v19 = vadd.f32 %v280_v18, %v261_v17 }
 0x136   :  { %283 = vst [vmem:[#allocation10] sm:$0xff] %v281_v19 }
 0x137   :  { %294 = dma.vmem_to_hbm [thread:$0]  %s290_s16, 128, %s292_s19, [#allocation4]  }
 0x138   :  { %442 = dma.done.wait [#allocation4], 128  }
 0x139   :  { %443 = vsyncadd [#allocation4], 4294967168 }
 0x13a   :  { %299 = vsyncpa [#allocation3], 1 }
 0x13b   :  { %300 = vsyncpa [#allocation6], 1 }
 0x13c   :  { %301 = vsyncpa [#allocation9], 1 }
 0x13d   :  { %302 = vsyncpa [#allocation4], 1 }

</bundles_post_ra>
